<compile_context>
chip_gen: v6e
topology: v6e:2x2x1
jax: 0.10.0
libtpu: 0.0.40
codegen_flags: <defaults>
</compile_context>

<pallas_src>
import jax
import jax.numpy as jnp
from jax.experimental import pallas as pl
from jax.experimental.pallas import tpu as pltpu

_LANES = 128
_ACC_ROWS = 64     # (64,128) accumulator = 8 independent vreg add chains (ILP)
_OUT_ROWS = 8      # per-core partial output is one lane-dense (8,128) block
_TM_MAX = 4096     # rows per block: 2 MiB f32 per input per pipeline buffer


def _cdiv(a, b):
    return -(-a // b)


def _round_up(x, m):
    return _cdiv(x, m) * m


def _make_sumsq_kernel(tm, tiles_per_core, rows_valid, needs_mask):
    """Per-core sum of squared differences.

    Grid = (ncores, tiles_per_core).  Axis 0 is the TensorCore split (v7x only),
    axis 1 the sequential reduction.  The hot loop is pure VPU mul/add into a
    (64, 128) scratch; the sublane fold to (8, 128) happens once per core in
    the epilogue.
    """

    def kernel(yhat_ref, y_ref, o_ref, acc_ref):
        c = pl.program_id(0)
        i = pl.program_id(1)

        @pl.when(i == 0)
        def _():
            acc_ref[...] = jnp.zeros_like(acc_ref)

        # Cast on the VPU (free under the HBM bound) instead of streaming
        # upcast f32 copies from HBM.
        diff = yhat_ref[...].astype(jnp.float32) - y_ref[...].astype(jnp.float32)
        sq = diff * diff

        if needs_mask:
            # Ragged tail / core-overshoot tiles: zero contributions from rows
            # at or past rows_valid (their VMEM contents are unspecified; the
            # select ignores them even if they are inf/NaN).
            row0 = (c * tiles_per_core + i) * tm
            row_ids = row0 + jax.lax.broadcasted_iota(jnp.int32, (tm, _LANES), 0)
            sq = jnp.where(row_ids < rows_valid, sq, 0.0)

        # (tm,128) -> (tm//64, 64, 128): leading-dim-only reshape (no (8,128)
        # tile crossing); sum(axis=0) feeds 8 independent vreg accumulators.
        acc_ref[...] += sq.reshape(-1, _ACC_ROWS, _LANES).sum(axis=0)

        @pl.when(i == tiles_per_core - 1)
        def _():
            # Fold 64 -> 8 sublanes; lane-dense (8,128) write lowers cleanly
            # for any core count.
            o_ref[...] = acc_ref[...].reshape(-1, _OUT_ROWS, _LANES).sum(axis=0)

    return kernel


def rmse_loss(yhat, y, eps=1e-6):
    """sqrt(mean((yhat - y)**2) + eps) -- matches RMSELoss.forward."""
    assert yhat.shape == y.shape, "yhat and y must have the same shape"
    n_elems = yhat.size
    assert n_elems > 0, "RMSELoss on empty tensors is undefined"

    # Flatten in native dtype (no f32 upcast copy, no concatenate).
    yhat_f = yhat.reshape(-1)
    y_f = y.reshape(-1)

    # Lane alignment: only a non-128-multiple element count pays a pad, and it
    # is <=127 identical zeros on BOTH operands (zero squared error).  The
    # common 128-aligned case is copy-free; row raggedness is masked in-kernel.
    rem = n_elems % _LANES
    if rem:
        yhat_f = jnp.pad(yhat_f, (0, _LANES - rem))
        y_f = jnp.pad(y_f, (0, _LANES - rem))
    rows = yhat_f.size // _LANES
    yhat_2d = yhat_f.reshape(rows, _LANES)
    y_2d = y_f.reshape(rows, _LANES)

    # Row tile: multiples of 64 keep the 8-way accumulator reshape legal and
    # satisfy f32/bf16/int8 min-tile sublane rules; big tiles amortize the
    # ~0.35us per-grid-step overhead.
    tm = min(_TM_MAX, _round_up(rows, _ACC_ROWS))
    tiles = _cdiv(rows, tm)

    # Split the reduction across TensorCores only on multi-TC chips (v7x);
    # v5e/v6e are single-TC, where the split would only add init/epilogue work.
    device_kind = jax.devices()[0].device_kind.lower()
    multi_tc = "v7" in device_kind
    ncores = 2 if (multi_tc and tiles >= 2) else 1
    tiles_per_core = _cdiv(tiles, ncores)
    needs_mask = (ncores * tiles_per_core * tm) != rows

    # Clamp overshoot block indices (odd tile count split across 2 cores) so a
    # DMA never starts past the array; their contribution is masked to zero.
    def in_map(c, i):
        return (jnp.minimum(c * tiles_per_core + i, tiles - 1), 0)

    kernel = _make_sumsq_kernel(tm, tiles_per_core, rows, needs_mask)

    if ncores > 1:
        # TODO(synk): verify with a bundle dump / xprof that CORE_PARALLEL
        # actually engages both v7x TensorCores for this grid.
        dim_sem = (pltpu.CORE_PARALLEL, pltpu.ARBITRARY)
    else:
        dim_sem = (pltpu.ARBITRARY, pltpu.ARBITRARY)

    cost = pl.CostEstimate(
        flops=3 * n_elems,                       # sub + mul + add per element
        transcendentals=0,
        bytes_accessed=int(
            rows * _LANES * (yhat_2d.dtype.itemsize + y_2d.dtype.itemsize)
            + ncores * _OUT_ROWS * _LANES * 4
        ),
    )

    partials = pl.pallas_call(
        kernel,
        out_shape=jax.ShapeDtypeStruct((ncores * _OUT_ROWS, _LANES), jnp.float32),
        grid_spec=pltpu.PrefetchScalarGridSpec(
            num_scalar_prefetch=0,
            grid=(ncores, tiles_per_core),
            in_specs=[
                pl.BlockSpec((tm, _LANES), in_map),
                pl.BlockSpec((tm, _LANES), in_map),
            ],
            out_specs=pl.BlockSpec((_OUT_ROWS, _LANES), lambda c, i: (c, 0)),
            scratch_shapes=[pltpu.VMEM((_ACC_ROWS, _LANES), jnp.float32)],
        ),
        compiler_params=pltpu.CompilerParams(dimension_semantics=dim_sem),
        cost_estimate=cost,
    )(yhat_2d, y_2d)

    # Tiny host-side finalize: combine per-core lane-dense partials, then
    # mean + eps + sqrt (== torch.sqrt(MSELoss(yhat, y) + eps)).
    mse = jnp.sum(partials) / jnp.float32(n_elems)
    return jnp.sqrt(mse + jnp.float32(eps))


if __name__ == "__main__":
    key = jax.random.PRNGKey(0)
    k1, k2 = jax.random.split(key)

    # Small shapes consistent with a CNN-LSTM regression head (NCHW-like preds).
    yhat = jax.random.normal(k1, (2, 4, 16, 16), dtype=jnp.float32)
    y = jax.random.normal(k2, (2, 4, 16, 16), dtype=jnp.float32)
    loss = rmse_loss(yhat, y)
    jax.block_until_ready(loss)
    ref = jnp.sqrt(jnp.mean((yhat - y) ** 2) + 1e-6)
    assert jnp.allclose(loss, ref, rtol=1e-5, atol=1e-6), (loss, ref)

    # Ragged (non-128-multiple) sanity check exercising the in-kernel row mask.
    k3, k4 = jax.random.split(k2)
    a = jax.random.normal(k3, (3, 5, 7), dtype=jnp.float32)
    b = jax.random.normal(k4, (3, 5, 7), dtype=jnp.float32)
    loss2 = rmse_loss(a, b)
    jax.block_until_ready(loss2)
    ref2 = jnp.sqrt(jnp.mean((a - b) ** 2) + 1e-6)
    assert jnp.allclose(loss2, ref2, rtol=1e-5, atol=1e-6), (loss2, ref2)

    print("KERNEL_OK")
</pallas_src>

<mosaic_0001>
module attributes {stable_mosaic.version = 11 : i64} {
  func.func @kernel(%arg0: i32, %arg1: i32, %arg2: memref<64x128xf32, #tpu.memory_space<vmem>>, %arg3: memref<64x128xf32, #tpu.memory_space<vmem>>, %arg4: memref<8x128xf32, #tpu.memory_space<vmem>>, %arg5: memref<64x128xf32, #tpu.memory_space<vmem>>) attributes {dimension_semantics = [#tpu.dimension_semantics<arbitrary>, #tpu.dimension_semantics<arbitrary>], iteration_bounds = array<i64: 1, 1>, scalar_prefetch = 0 : i64, scratch_operands = 1 : i64, tpu.core_type = #tpu.core_type<tc>, window_params = [{transform_indices = @transform_0, window_bounds = array<i64: 64, 128>}, {transform_indices = @transform_1, window_bounds = array<i64: 64, 128>}, {transform_indices = @transform_2, window_bounds = array<i64: 8, 128>}]} {
    %c0_i32 = arith.constant 0 : i32
    %0 = arith.cmpi eq, %arg1, %c0_i32 : i32
    %1 = arith.extui %0 : i1 to i32
    %c0_i32_0 = arith.constant 0 : i32
    %2 = arith.cmpi ne, %1, %c0_i32_0 : i32
    scf.if %2 {
      %cst_11 = arith.constant 0.000000e+00 : f32
      %25 = vector.broadcast %cst_11 : f32 to vector<64x128xf32>
      %c0_12 = arith.constant 0 : index
      %c0_13 = arith.constant 0 : index
      %26 = vector.load %arg5[%c0_12, %c0_13] : memref<64x128xf32, #tpu.memory_space<vmem>>, vector<64x128xf32>
      tpu.vector_store %arg5[%c0_12, %c0_13], %25 {strides = array<i32>} : memref<64x128xf32, #tpu.memory_space<vmem>>, vector<64x128xf32>,
    } else {
    }
    %c0 = arith.constant 0 : index
    %c0_1 = arith.constant 0 : index
    %3 = vector.load %arg2[%c0, %c0_1] : memref<64x128xf32, #tpu.memory_space<vmem>>, vector<64x128xf32>
    %c0_2 = arith.constant 0 : index
    %c0_3 = arith.constant 0 : index
    %4 = vector.load %arg3[%c0_2, %c0_3] : memref<64x128xf32, #tpu.memory_space<vmem>>, vector<64x128xf32>
    %5 = arith.subf %3, %4 : vector<64x128xf32>
    %6 = arith.mulf %5, %5 : vector<64x128xf32>
    %c1_i32 = arith.constant 1 : i32
    %7 = arith.muli %arg0, %c1_i32 : i32
    %8 = arith.addi %7, %arg1 : i32
    %c64_i32 = arith.constant 64 : i32
    %9 = arith.muli %8, %c64_i32 : i32
    %10 = tpu.iota {dimensions = array<i32: 0>} : vector<64x128xi32>
    %11 = vector.broadcast %9 : i32 to vector<64x128xi32>
    %12 = arith.addi %11, %10 : vector<64x128xi32>
    %c16_i32 = arith.constant 16 : i32
    %13 = vector.broadcast %c16_i32 : i32 to vector<64x128xi32>
    %14 = arith.cmpi slt, %12, %13 : vector<64x128xi32>
    %cst = arith.constant 0.000000e+00 : f32
    %15 = vector.broadcast %cst : f32 to vector<64x128xf32>
    %16 = arith.select %14, %6, %15 : vector<64x128xi1>, vector<64x128xf32>
    %c0_4 = arith.constant 0 : index
    %c0_5 = arith.constant 0 : index
    %17 = vector.load %arg5[%c0_4, %c0_5] : memref<64x128xf32, #tpu.memory_space<vmem>>, vector<64x128xf32>
    %18 = vector.shape_cast %16 : vector<64x128xf32> to vector<1x64x128xf32>
    %cst_6 = arith.constant dense<0.000000e+00> : vector<64x128xf32>
    %19 = vector.multi_reduction <add>, %18, %cst_6 [0] : vector<1x64x128xf32> to vector<64x128xf32>
    %20 = arith.addf %17, %19 : vector<64x128xf32>
    %c0_7 = arith.constant 0 : index
    %c0_8 = arith.constant 0 : index
    %21 = vector.load %arg5[%c0_7, %c0_8] : memref<64x128xf32, #tpu.memory_space<vmem>>, vector<64x128xf32>
    tpu.vector_store %arg5[%c0_7, %c0_8], %20 {strides = array<i32>} : memref<64x128xf32, #tpu.memory_space<vmem>>, vector<64x128xf32>,
    %c0_i32_9 = arith.constant 0 : i32
    %22 = arith.cmpi eq, %arg1, %c0_i32_9 : i32
    %23 = arith.extui %22 : i1 to i32
    %c0_i32_10 = arith.constant 0 : i32
    %24 = arith.cmpi ne, %23, %c0_i32_10 : i32
    scf.if %24 {
      %c0_11 = arith.constant 0 : index
      %c0_12 = arith.constant 0 : index
      %25 = vector.load %arg5[%c0_11, %c0_12] : memref<64x128xf32, #tpu.memory_space<vmem>>, vector<64x128xf32>
      %26 = vector.shape_cast %25 : vector<64x128xf32> to vector<8x8x128xf32>
      %cst_13 = arith.constant dense<0.000000e+00> : vector<8x128xf32>
      %27 = vector.multi_reduction <add>, %26, %cst_13 [0] : vector<8x8x128xf32> to vector<8x128xf32>
      %c0_14 = arith.constant 0 : index
      %c0_15 = arith.constant 0 : index
      %28 = vector.load %arg4[%c0_14, %c0_15] : memref<8x128xf32, #tpu.memory_space<vmem>>, vector<8x128xf32>
      tpu.vector_store %arg4[%c0_14, %c0_15], %27 {strides = array<i32>} : memref<8x128xf32, #tpu.memory_space<vmem>>, vector<8x128xf32>,
    } else {
    }
    return
  }
  func.func @transform_0(%arg0: i32, %arg1: i32) -> (i32, i32) {
    %c1_i32 = arith.constant 1 : i32
    %0 = arith.muli %arg0, %c1_i32 : i32
    %1 = arith.addi %0, %arg1 : i32
    %c0_i32 = arith.constant 0 : i32
    %2 = arith.minsi %1, %c0_i32 : i32
    %c0_i32_0 = arith.constant 0 : i32
    %c0_i32_1 = arith.constant 0 : i32
    return %2, %c0_i32_0 : i32, i32
  }
  func.func @transform_1(%arg0: i32, %arg1: i32) -> (i32, i32) {
    %c1_i32 = arith.constant 1 : i32
    %0 = arith.muli %arg0, %c1_i32 : i32
    %1 = arith.addi %0, %arg1 : i32
    %c0_i32 = arith.constant 0 : i32
    %2 = arith.minsi %1, %c0_i32 : i32
    %c0_i32_0 = arith.constant 0 : i32
    %c0_i32_1 = arith.constant 0 : i32
    return %2, %c0_i32_0 : i32, i32
  }
  func.func @transform_2(%arg0: i32, %arg1: i32) -> (i32, i32) {
    %c0_i32 = arith.constant 0 : i32
    %c0_i32_0 = arith.constant 0 : i32
    return %arg0, %c0_i32 : i32, i32
  }
}

</mosaic_0001>

<bundles_post_ra>
// kernel: tpu_custom_call.1
= control target key start
LH: loop header
LB: loop body
LE: loop exit
PB: predicated region body
PF: predicated region fallthrough
CT: control target
= control target key end

     0   :  { %7 = vsyncpa [#allocation4], 0  ;;  %s323_s0 = inlined_call_operand.hbm [shape: f32[16,128], index: 0, kind: input, shape index: {}]   ;;  %s324_s1 = inlined_call_operand.hbm [shape: f32[16,128], index: 1, kind: input, shape index: {}]   ;;  %s325_s2 = inlined_call_operand.hbm [shape: f32[8,128], index: 2, kind: output, shape index: {}]  }
   0x1   :  { %8 = vsyncpa [#allocation7], 0 }
   0x2   :  { %9 = vsyncpa [#allocation5], 0 }
   0x3   :  { %20 = vsyncadd [#allocation4], 768  ;;  %s294_s9 = smov [#allocation3]  }
   0x4   :  { %s25_s10 = sshll.u32 %s294_s9, 4  ;;  %s26_s10 = int_to_ptr.vmem [resolvable:$true] %s25_s10 }
   0x5   :  { %s236_s11 = scalar_lea.vmem %s26_s10, 256  ;;  %s240_s12 = scalar_lea.vmem %s26_s10, 1024 }
   0x6   :  { %p237_p0 = scmp.ne.s32.totalorder %s26_s10, %s236_s11  ;;  %p241_p1 = scmp.lt.s32.totalorder %s26_s10, %s26_s10 }
   0x7   :  { %p242_p2 = scmp.lt.s32.totalorder %s240_s12, %s236_s11 }
   0x9   :  { %p243_p3 = por %p242_p2, %p241_p1 }
   0xb   :  { %p244_p4 = pnand %p243_p3, %p237_p0 }
   0xd   :  { %247 = shalt.err (!%p244_p4)
}
   0xe   :  { %s295_s13 = smov 128   ;;  %s296_s14 = smov 8  }
   0xf   :  { %31 = dma.hbm_to_vmem [thread:$0]  %s323_s0, 256, %s26_s10, [#allocation4], %s295_s13, %s295_s13, %s296_s14  }
  0x10   :  { %42 = vsyncadd [#allocation7], 768  ;;  %s297_s17 = smov [#allocation6]  }
  0x11   :  { %s47_s18 = sshll.u32 %s297_s17, 4  ;;  %s48_s18 = int_to_ptr.vmem [resolvable:$true] %s47_s18 }
  0x12   :  { %s256_s19 = scalar_lea.vmem %s48_s18, 256  ;;  %s260_s20 = scalar_lea.vmem %s48_s18, 1024 }
  0x13   :  { %p257_p5 = scmp.ne.s32.totalorder %s48_s18, %s256_s19  ;;  %p261_p6 = scmp.lt.s32.totalorder %s48_s18, %s48_s18 }
  0x14   :  { %p262_p7 = scmp.lt.s32.totalorder %s260_s20, %s256_s19 }
  0x16   :  { %p263_p8 = por %p262_p7, %p261_p6 }
  0x18   :  { %p264_p9 = pnand %p263_p8, %p257_p5 }
  0x1a   :  { %267 = shalt.err (!%p264_p9)
}
  0x1b   :  { %53 = dma.hbm_to_vmem [thread:$0]  %s324_s1, 256, %s48_s18, [#allocation7], %s295_s13, %s295_s13, %s296_s14  }
  0x1c   :  { %288 = dma.done.wait [#allocation4], 1024  }
  0x1d   :  { %289 = vsyncadd [#allocation4], 4294966272 }
  0x1e   :  { %290 = dma.done.wait [#allocation7], 1024  }
  0x1f   :  { %291 = vsyncadd [#allocation7], 4294966272  ;;  %v84_v0 = vld [vmem:[#allocation3] sm:$0xff]  ;;  %v85_v1 = vld [vmem:[#allocation3 + $0x8] sm:$0xff]  ;;  %s298_s0 = smov [#allocation8]  }
  0x20   :  { %v92_v2 = vld [vmem:[#allocation6] sm:$0xff]  ;;  %v93_v3 = vld [vmem:[#allocation6 + $0x8] sm:$0xff]  ;;  %s209_s23 = sshll.u32 %s298_s0, 4  ;;  %s210_s23 = int_to_ptr.vmem [resolvable:$true] %s209_s23 }
  0x21   :  { %v100_v4 = vsub.f32 %v84_v0, %v92_v2  ;;  %v101_v5 = vsub.f32 %v85_v1, %v93_v3  ;;  %s268_s24 = scalar_lea.vmem %s210_s23, 128  ;;  %p273_p11 = scmp.lt.s32.totalorder %s210_s23, %s210_s23 }
  0x22   :  { %p269_p10 = scmp.ne.s32.totalorder %s210_s23, %s268_s24  ;;  %p274_p12 = scmp.lt.s32.totalorder %s268_s24, %s268_s24 }
  0x23   :  { %v108_v6 = vmul.f32 %v100_v4, %v100_v4  ;;  %v109_v7 = vmul.f32 %v101_v5, %v101_v5 }
  0x24   :  { %p275_p13 = por %p274_p12, %p273_p11 }
  0x25   :  { %v195_v8 = vadd.f32 %v109_v7, %v108_v6 }
  0x26   :  { %p276_p0 = pnand %p275_p13, %p269_p10 }
  0x27   :  { %202 = vst [vmem:[#allocation8] sm:$0xff] %v195_v8 }
  0x28   :  { %279 = shalt.err (!%p276_p0)
}
  0x29   :  { %212 = dma.vmem_to_hbm [thread:$0]  %s210_s23, 128, %s325_s2, [#allocation5]  }
  0x2a   :  { %292 = dma.done.wait [#allocation5], 128  }
  0x2b   :  { %293 = vsyncadd [#allocation5], 4294967168 }
  0x2c   :  { %216 = vsyncpa [#allocation4], 1 }
  0x2d   :  { %217 = vsyncpa [#allocation7], 1 }
  0x2e   :  { %218 = vsyncpa [#allocation5], 1 }

</bundles_post_ra>
